<compile_context>
chip_gen: v6e
topology: v6e:2x2x1
jax: 0.10.0
libtpu: 0.0.40
codegen_flags: <defaults>
</compile_context>

<pallas_src>
import jax
import jax.numpy as jnp
from jax.experimental import pallas as pl
from jax.experimental.pallas import tpu as pltpu


def _round_up(a: int, b: int) -> int:
    return -(-a // b) * b


def _weight_norm(v, g):
    """PyTorch weight_norm (dim=0): w[o] = g[o] * v[o] / ||v[o]||_2."""
    norm = jnp.sqrt(jnp.sum(v * v, axis=tuple(range(1, v.ndim)), keepdims=True))
    return g * v / norm


def _make_temporal_block_kernel(k, d, p, tl, c_in, c_out, has_down):
    """Returns the fused TemporalBlock kernel (statics closed over)."""

    def kernel(x_ref, w1_ref, b1_ref, w2_ref, b2_ref, alpha_ref, *rest):
        if has_down:
            wd_ref, bd_ref, o_ref, xext_ref, h1ext_ref = rest
        else:
            o_ref, xext_ref, h1ext_ref = rest

        li = pl.program_id(1)  # length-tile index (sequential / "arbitrary")

        # --- causal halo management (this IS the chomp, fused & for free) ----
        @pl.when(li == 0)
        def _init_halo():
            # Left zero-padding of the causal conv.
            xext_ref[:, :p] = jnp.zeros((c_in, p), jnp.float32)
            h1ext_ref[:, :p] = jnp.zeros((c_out, p), jnp.float32)

        @pl.when(li > 0)
        def _carry_halo():
            # Last p columns of the previous tile become this tile's left halo.
            xext_ref[:, :p] = xext_ref[:, tl:tl + p]
            h1ext_ref[:, :p] = h1ext_ref[:, tl:tl + p]

        x_tile = x_ref[0].astype(jnp.float32)          # (c_in, tl)
        xext_ref[:, p:] = x_tile                       # xext = [halo | current tile]

        a1 = alpha_ref[0]
        a2 = alpha_ref[1]
        a3 = alpha_ref[2]

        # --- conv1 (dilated, causal) + bias + PReLU ---------------------------
        acc = jnp.zeros((c_out, tl), jnp.float32)
        for j in range(k):                             # k tap-matmuls on the MXU
            acc += jnp.dot(w1_ref[j], xext_ref[:, j * d:j * d + tl],
                           preferred_element_type=jnp.float32)
        acc += b1_ref[...]
        h1 = jnp.where(acc > 0, acc, a1 * acc)         # PReLU1
        # TODO(synk): dropout1/dropout2 are identity (eval-mode forward); use
        # pltpu.prng_seed/prng_random_bits for training-mode dropout.

        h1ext_ref[:, p:] = h1                          # h1ext = [halo | h1 tile]

        # --- conv2 (dilated, causal) + bias + PReLU ---------------------------
        acc2 = jnp.zeros((c_out, tl), jnp.float32)
        for j in range(k):
            acc2 += jnp.dot(w2_ref[j], h1ext_ref[:, j * d:j * d + tl],
                            preferred_element_type=jnp.float32)
        acc2 += b2_ref[...]
        h2 = jnp.where(acc2 > 0, acc2, a2 * acc2)      # PReLU2

        # --- residual path + final PReLU --------------------------------------
        if has_down:
            res = jnp.dot(wd_ref[...], x_tile,
                          preferred_element_type=jnp.float32) + bd_ref[...]
        else:
            res = x_tile

        y = h2 + res
        o_ref[0] = jnp.where(y > 0, y, a3 * y).astype(o_ref.dtype)

    return kernel


def temporal_block_forward(
    x,
    conv1_v, conv1_g, conv1_b,
    conv2_v, conv2_g, conv2_b,
    prelu1_a, prelu2_a, prelu_out_a,
    downsample_w=None, downsample_b=None,
    *, kernel_size, stride=1, dilation=1, padding=0,
):
    """Fused TemporalBlock forward. x: (N, C_in, L) -> (N, C_out, L)."""
    if stride != 1:
        raise NotImplementedError("TCN TemporalBlock requires stride=1.")
    if padding < 1 or padding != (kernel_size - 1) * dilation:
        raise ValueError("padding must equal (kernel_size-1)*dilation (causal TCN).")

    n, c_in, seq_len = x.shape
    c_out = conv1_v.shape[0]
    k, d, p = kernel_size, dilation, padding
    has_down = downsample_w is not None
    if not has_down and c_in != c_out:
        raise ValueError("downsample weights required when n_inputs != n_outputs.")

    # Fold weight-norm once (outside the kernel; tiny).
    w1 = _weight_norm(conv1_v, conv1_g)                              # (c_out, c_in, k)
    w2 = _weight_norm(conv2_v, conv2_g)                              # (c_out, c_out, k)
    w1_t = jnp.transpose(w1, (2, 0, 1)).astype(jnp.float32)          # (k, c_out, c_in)
    w2_t = jnp.transpose(w2, (2, 0, 1)).astype(jnp.float32)          # (k, c_out, c_out)
    b1 = conv1_b.reshape(c_out, 1).astype(jnp.float32)
    b2 = conv2_b.reshape(c_out, 1).astype(jnp.float32)
    alphas = jnp.stack([jnp.asarray(prelu1_a, jnp.float32).reshape(()),
                        jnp.asarray(prelu2_a, jnp.float32).reshape(()),
                        jnp.asarray(prelu_out_a, jnp.float32).reshape(())])

    # Lane-dense length tiles: multiple of 128, >= padding (single-tile halo),
    # targeting 512 lanes for long sequences (~HBM roofline sweet spot).
    tl = max(128, _round_up(p, 128))
    if seq_len >= 512:
        tl = max(tl, 512)
    l_pad = _round_up(seq_len, tl)
    if l_pad != seq_len:
        x = jnp.pad(x, ((0, 0), (0, 0), (0, l_pad - seq_len)))
    n_lt = l_pad // tl

    in_specs = [
        pl.BlockSpec((1, c_in, tl), lambda b, l: (b, 0, l)),         # x tile
        pl.BlockSpec((k, c_out, c_in), lambda b, l: (0, 0, 0)),      # conv1 weight
        pl.BlockSpec((c_out, 1), lambda b, l: (0, 0)),               # conv1 bias
        pl.BlockSpec((k, c_out, c_out), lambda b, l: (0, 0, 0)),     # conv2 weight
        pl.BlockSpec((c_out, 1), lambda b, l: (0, 0)),               # conv2 bias
        pl.BlockSpec(memory_space=pltpu.MemorySpace.SMEM),           # PReLU alphas (scalars)
    ]
    args = [x, w1_t, b1, w2_t, b2, alphas]
    if has_down:
        wd = downsample_w.reshape(c_out, c_in).astype(jnp.float32)
        bd = downsample_b.reshape(c_out, 1).astype(jnp.float32)
        in_specs += [
            pl.BlockSpec((c_out, c_in), lambda b, l: (0, 0)),        # 1x1 downsample weight
            pl.BlockSpec((c_out, 1), lambda b, l: (0, 0)),           # downsample bias
        ]
        args += [wd, bd]

    kernel = _make_temporal_block_kernel(k, d, p, tl, c_in, c_out, has_down)

    out = pl.pallas_call(
        kernel,
        out_shape=jax.ShapeDtypeStruct((n, c_out, l_pad), x.dtype),
        grid=(n, n_lt),
        in_specs=in_specs,
        out_specs=pl.BlockSpec((1, c_out, tl), lambda b, l: (b, 0, l)),
        scratch_shapes=[
            pltpu.VMEM((c_in, p + tl), jnp.float32),    # x + causal halo (carried over L tiles)
            pltpu.VMEM((c_out, p + tl), jnp.float32),   # h1 + causal halo
        ],
        compiler_params=pltpu.CompilerParams(
            dimension_semantics=("parallel", "arbitrary")),
    )(*args)

    return out[:, :, :seq_len]


# ----------------------------- reference (plain JAX, mirrors PyTorch) ---------
def _reference_temporal_block(x, conv1_v, conv1_g, conv1_b, conv2_v, conv2_g,
                              conv2_b, a1, a2, a_out, down_w, down_b,
                              *, kernel_size, dilation, padding):
    w1 = _weight_norm(conv1_v, conv1_g)
    w2 = _weight_norm(conv2_v, conv2_g)

    def conv1d(inp, w, b, pad, dil):
        y = jax.lax.conv_general_dilated(
            inp, w, window_strides=(1,), padding=[(pad, pad)],
            rhs_dilation=(dil,), dimension_numbers=("NCH", "OIH", "NCH"))
        return y + b[None, :, None]

    prelu = lambda v, a: jnp.where(v > 0, v, a * v)

    out = prelu(conv1d(x, w1, conv1_b, padding, dilation)[:, :, :-padding], a1)
    out = prelu(conv1d(out, w2, conv2_b, padding, dilation)[:, :, :-padding], a2)
    res = conv1d(x, down_w, down_b, 0, 1)
    return prelu(out + res, a_out)


if __name__ == "__main__":
    key = jax.random.PRNGKey(0)
    batch, n_inputs, n_outputs, seq = 2, 4, 8, 16
    kernel_size, stride, dilation = 3, 1, 2
    padding = (kernel_size - 1) * dilation  # 4 -> chomp size

    ks = jax.random.split(key, 8)
    conv1_v = 0.01 * jax.random.normal(ks[0], (n_outputs, n_inputs, kernel_size), jnp.float32)
    conv1_g = 0.05 * (1.0 + 0.1 * jax.random.normal(ks[1], (n_outputs, 1, 1), jnp.float32))
    conv1_b = 0.1 * jax.random.normal(ks[2], (n_outputs,), jnp.float32)
    conv2_v = 0.01 * jax.random.normal(ks[3], (n_outputs, n_outputs, kernel_size), jnp.float32)
    conv2_g = 0.05 * (1.0 + 0.1 * jax.random.normal(ks[4], (n_outputs, 1, 1), jnp.float32))
    conv2_b = 0.1 * jax.random.normal(ks[5], (n_outputs,), jnp.float32)
    down_w = 0.01 * jax.random.normal(ks[6], (n_outputs, n_inputs, 1), jnp.float32)
    down_b = 0.1 * jax.random.normal(ks[7], (n_outputs,), jnp.float32)
    a1, a2, a_out = 0.25, 0.25, 0.25  # nn.PReLU() default single parameter

    x = jax.random.normal(jax.random.PRNGKey(1), (batch, n_inputs, seq), jnp.float32)

    y = temporal_block_forward(
        x, conv1_v, conv1_g, conv1_b, conv2_v, conv2_g, conv2_b,
        a1, a2, a_out, down_w, down_b,
        kernel_size=kernel_size, stride=stride, dilation=dilation, padding=padding)
    y = jax.block_until_ready(y)

    y_ref = _reference_temporal_block(
        x, conv1_v, conv1_g, conv1_b, conv2_v, conv2_g, conv2_b,
        a1, a2, a_out, down_w, down_b,
        kernel_size=kernel_size, dilation=dilation, padding=padding)

    assert y.shape == (batch, n_outputs, seq), y.shape
    assert y.dtype == x.dtype
    max_err = float(jnp.max(jnp.abs(y - y_ref)))
    assert jnp.allclose(y, y_ref, atol=2e-3, rtol=2e-2), f"max abs err {max_err}"

    print("KERNEL_OK")
</pallas_src>

<mosaic_0001>
module attributes {stable_mosaic.version = 11 : i64} {
  func.func @kernel(%arg0: i32, %arg1: i32, %arg2: memref<1x4x128xf32, #tpu.memory_space<vmem>>, %arg3: memref<3x8x4xf32, #tpu.memory_space<vmem>>, %arg4: memref<8x1xf32, #tpu.memory_space<vmem>>, %arg5: memref<3x8x8xf32, #tpu.memory_space<vmem>>, %arg6: memref<8x1xf32, #tpu.memory_space<vmem>>, %arg7: memref<3xf32, #tpu.memory_space<smem>>, %arg8: memref<8x4xf32, #tpu.memory_space<vmem>>, %arg9: memref<8x1xf32, #tpu.memory_space<vmem>>, %arg10: memref<1x8x128xf32, #tpu.memory_space<vmem>>, %arg11: memref<4x132xf32, #tpu.memory_space<vmem>>, %arg12: memref<8x132xf32, #tpu.memory_space<vmem>>) attributes {dimension_semantics = [#tpu.dimension_semantics<parallel>, #tpu.dimension_semantics<arbitrary>], iteration_bounds = array<i64: 2, 1>, scalar_prefetch = 0 : i64, scratch_operands = 2 : i64, tpu.core_type = #tpu.core_type<tc>, window_params = [{transform_indices = @transform_0, window_bounds = array<i64: 1, 4, 128>}, {pipeline_mode = #tpu.pipeline_mode<synchronous>, transform_indices = @transform_1, window_bounds = array<i64: 3, 8, 4>}, {pipeline_mode = #tpu.pipeline_mode<synchronous>, transform_indices = @transform_2, window_bounds = array<i64: 8, 1>}, {pipeline_mode = #tpu.pipeline_mode<synchronous>, transform_indices = @transform_3, window_bounds = array<i64: 3, 8, 8>}, {pipeline_mode = #tpu.pipeline_mode<synchronous>, transform_indices = @transform_4, window_bounds = array<i64: 8, 1>}, {transform_indices = @transform_5, window_bounds = array<i64: 3>}, {pipeline_mode = #tpu.pipeline_mode<synchronous>, transform_indices = @transform_6, window_bounds = array<i64: 8, 4>}, {pipeline_mode = #tpu.pipeline_mode<synchronous>, transform_indices = @transform_7, window_bounds = array<i64: 8, 1>}, {transform_indices = @transform_8, window_bounds = array<i64: 1, 8, 128>}]} {
    %c0_i32 = arith.constant 0 : i32
    %0 = arith.cmpi eq, %arg1, %c0_i32 : i32
    %1 = arith.extui %0 : i1 to i32
    %c0_i32_0 = arith.constant 0 : i32
    %2 = arith.cmpi ne, %1, %c0_i32_0 : i32
    scf.if %2 {
      %cst_61 = arith.constant 0.000000e+00 : f32
      %75 = vector.broadcast %cst_61 : f32 to vector<4x4xf32>
      %c0_62 = arith.constant 0 : index
      %c0_63 = arith.constant 0 : index
      %76 = vector.load %arg11[%c0_62, %c0_63] : memref<4x132xf32, #tpu.memory_space<vmem>>, vector<4x4xf32>
      tpu.vector_store %arg11[%c0_62, %c0_63], %75 {strides = array<i32>} : memref<4x132xf32, #tpu.memory_space<vmem>>, vector<4x4xf32>,
      %cst_64 = arith.constant 0.000000e+00 : f32
      %77 = vector.broadcast %cst_64 : f32 to vector<8x4xf32>
      %c0_65 = arith.constant 0 : index
      %c0_66 = arith.constant 0 : index
      %78 = vector.load %arg12[%c0_65, %c0_66] : memref<8x132xf32, #tpu.memory_space<vmem>>, vector<8x4xf32>
      tpu.vector_store %arg12[%c0_65, %c0_66], %77 {strides = array<i32>} : memref<8x132xf32, #tpu.memory_space<vmem>>, vector<8x4xf32>,
    } else {
    }
    %c0_i32_1 = arith.constant 0 : i32
    %3 = arith.cmpi sgt, %arg1, %c0_i32_1 : i32
    %4 = arith.extui %3 : i1 to i32
    %c0_i32_2 = arith.constant 0 : i32
    %5 = arith.cmpi ne, %4, %c0_i32_2 : i32
    scf.if %5 {
      %c0_61 = arith.constant 0 : index
      %c128 = arith.constant 128 : index
      %75 = vector.load %arg11[%c0_61, %c128] : memref<4x132xf32, #tpu.memory_space<vmem>>, vector<4x4xf32>
      %c0_62 = arith.constant 0 : index
      %c0_63 = arith.constant 0 : index
      %76 = vector.load %arg11[%c0_62, %c0_63] : memref<4x132xf32, #tpu.memory_space<vmem>>, vector<4x4xf32>
      tpu.vector_store %arg11[%c0_62, %c0_63], %75 {strides = array<i32>} : memref<4x132xf32, #tpu.memory_space<vmem>>, vector<4x4xf32>,
      %c0_64 = arith.constant 0 : index
      %c128_65 = arith.constant 128 : index
      %77 = vector.load %arg12[%c0_64, %c128_65] : memref<8x132xf32, #tpu.memory_space<vmem>>, vector<8x4xf32>
      %c0_66 = arith.constant 0 : index
      %c0_67 = arith.constant 0 : index
      %78 = vector.load %arg12[%c0_66, %c0_67] : memref<8x132xf32, #tpu.memory_space<vmem>>, vector<8x4xf32>
      tpu.vector_store %arg12[%c0_66, %c0_67], %77 {strides = array<i32>} : memref<8x132xf32, #tpu.memory_space<vmem>>, vector<8x4xf32>,
    } else {
    }
    %c0 = arith.constant 0 : index
    %c0_3 = arith.constant 0 : index
    %c0_4 = arith.constant 0 : index
    %6 = vector.load %arg2[%c0, %c0_3, %c0_4] : memref<1x4x128xf32, #tpu.memory_space<vmem>>, vector<1x4x128xf32>
    %7 = vector.shape_cast %6 : vector<1x4x128xf32> to vector<4x128xf32>
    %c0_5 = arith.constant 0 : index
    %c4 = arith.constant 4 : index
    %8 = vector.load %arg11[%c0_5, %c4] : memref<4x132xf32, #tpu.memory_space<vmem>>, vector<4x128xf32>
    tpu.vector_store %arg11[%c0_5, %c4], %7 {strides = array<i32>} : memref<4x132xf32, #tpu.memory_space<vmem>>, vector<4x128xf32>,
    %c0_6 = arith.constant 0 : index
    %9 = memref.load %arg7[%c0_6] : memref<3xf32, #tpu.memory_space<smem>>
    %c1 = arith.constant 1 : index
    %10 = memref.load %arg7[%c1] : memref<3xf32, #tpu.memory_space<smem>>
    %c2 = arith.constant 2 : index
    %11 = memref.load %arg7[%c2] : memref<3xf32, #tpu.memory_space<smem>>
    %cst = arith.constant 0.000000e+00 : f32
    %12 = vector.broadcast %cst : f32 to vector<8x128xf32>
    %c0_7 = arith.constant 0 : index
    %c0_8 = arith.constant 0 : index
    %c0_9 = arith.constant 0 : index
    %13 = vector.load %arg3[%c0_7, %c0_8, %c0_9] : memref<3x8x4xf32, #tpu.memory_space<vmem>>, vector<1x8x4xf32>
    %14 = vector.shape_cast %13 : vector<1x8x4xf32> to vector<8x4xf32>
    %c0_10 = arith.constant 0 : index
    %c0_11 = arith.constant 0 : index
    %15 = vector.load %arg11[%c0_10, %c0_11] : memref<4x132xf32, #tpu.memory_space<vmem>>, vector<4x128xf32>
    %cst_12 = arith.constant dense<0.000000e+00> : vector<8x128xf32>
    %16 = tpu.matmul %14, %15, %cst_12 {dimension_numbers = #tpu.dot_dimension_numbers<[1], [0], [0], [1], [0, 0, 1, 1], [], []>} : vector<8x4xf32>, vector<4x128xf32>, vector<8x128xf32> -> vector<8x128xf32>
    %17 = arith.addf %12, %16 : vector<8x128xf32>
    %c1_13 = arith.constant 1 : index
    %c0_14 = arith.constant 0 : index
    %c0_15 = arith.constant 0 : index
    %18 = vector.load %arg3[%c1_13, %c0_14, %c0_15] : memref<3x8x4xf32, #tpu.memory_space<vmem>>, vector<1x8x4xf32>
    %19 = vector.shape_cast %18 : vector<1x8x4xf32> to vector<8x4xf32>
    %c0_16 = arith.constant 0 : index
    %c2_17 = arith.constant 2 : index
    %20 = vector.load %arg11[%c0_16, %c2_17] : memref<4x132xf32, #tpu.memory_space<vmem>>, vector<4x128xf32>
    %cst_18 = arith.constant dense<0.000000e+00> : vector<8x128xf32>
    %21 = tpu.matmul %19, %20, %cst_18 {dimension_numbers = #tpu.dot_dimension_numbers<[1], [0], [0], [1], [0, 0, 1, 1], [], []>} : vector<8x4xf32>, vector<4x128xf32>, vector<8x128xf32> -> vector<8x128xf32>
    %22 = arith.addf %17, %21 : vector<8x128xf32>
    %c2_19 = arith.constant 2 : index
    %c0_20 = arith.constant 0 : index
    %c0_21 = arith.constant 0 : index
    %23 = vector.load %arg3[%c2_19, %c0_20, %c0_21] : memref<3x8x4xf32, #tpu.memory_space<vmem>>, vector<1x8x4xf32>
    %24 = vector.shape_cast %23 : vector<1x8x4xf32> to vector<8x4xf32>
    %c0_22 = arith.constant 0 : index
    %c4_23 = arith.constant 4 : index
    %25 = vector.load %arg11[%c0_22, %c4_23] : memref<4x132xf32, #tpu.memory_space<vmem>>, vector<4x128xf32>
    %cst_24 = arith.constant dense<0.000000e+00> : vector<8x128xf32>
    %26 = tpu.matmul %24, %25, %cst_24 {dimension_numbers = #tpu.dot_dimension_numbers<[1], [0], [0], [1], [0, 0, 1, 1], [], []>} : vector<8x4xf32>, vector<4x128xf32>, vector<8x128xf32> -> vector<8x128xf32>
    %27 = arith.addf %22, %26 : vector<8x128xf32>
    %c0_25 = arith.constant 0 : index
    %c0_26 = arith.constant 0 : index
    %28 = vector.load %arg4[%c0_25, %c0_26] : memref<8x1xf32, #tpu.memory_space<vmem>>, vector<8x1xf32>
    %29 = vector.broadcast %28 : vector<8x1xf32> to vector<8x128xf32>
    %30 = arith.addf %27, %29 : vector<8x128xf32>
    %cst_27 = arith.constant 0.000000e+00 : f32
    %31 = vector.broadcast %cst_27 : f32 to vector<8x128xf32>
    %32 = arith.cmpf ogt, %30, %31 : vector<8x128xf32>
    %33 = vector.broadcast %9 : f32 to vector<8x128xf32>
    %34 = arith.mulf %33, %30 : vector<8x128xf32>
    %35 = arith.select %32, %30, %34 : vector<8x128xi1>, vector<8x128xf32>
    %c0_28 = arith.constant 0 : index
    %c4_29 = arith.constant 4 : index
    %36 = vector.load %arg12[%c0_28, %c4_29] : memref<8x132xf32, #tpu.memory_space<vmem>>, vector<8x128xf32>
    tpu.vector_store %arg12[%c0_28, %c4_29], %35 {strides = array<i32>} : memref<8x132xf32, #tpu.memory_space<vmem>>, vector<8x128xf32>,
    %cst_30 = arith.constant 0.000000e+00 : f32
    %37 = vector.broadcast %cst_30 : f32 to vector<8x128xf32>
    %c0_31 = arith.constant 0 : index
    %c0_32 = arith.constant 0 : index
    %c0_33 = arith.constant 0 : index
    %38 = vector.load %arg5[%c0_31, %c0_32, %c0_33] : memref<3x8x8xf32, #tpu.memory_space<vmem>>, vector<1x8x8xf32>
    %39 = vector.shape_cast %38 : vector<1x8x8xf32> to vector<8x8xf32>
    %c0_34 = arith.constant 0 : index
    %c0_35 = arith.constant 0 : index
    %40 = vector.load %arg12[%c0_34, %c0_35] : memref<8x132xf32, #tpu.memory_space<vmem>>, vector<8x128xf32>
    %cst_36 = arith.constant dense<0.000000e+00> : vector<8x128xf32>
    %41 = tpu.matmul %39, %40, %cst_36 {dimension_numbers = #tpu.dot_dimension_numbers<[1], [0], [0], [1], [0, 0, 1, 1], [], []>} : vector<8x8xf32>, vector<8x128xf32>, vector<8x128xf32> -> vector<8x128xf32>
    %42 = arith.addf %37, %41 : vector<8x128xf32>
    %c1_37 = arith.constant 1 : index
    %c0_38 = arith.constant 0 : index
    %c0_39 = arith.constant 0 : index
    %43 = vector.load %arg5[%c1_37, %c0_38, %c0_39] : memref<3x8x8xf32, #tpu.memory_space<vmem>>, vector<1x8x8xf32>
    %44 = vector.shape_cast %43 : vector<1x8x8xf32> to vector<8x8xf32>
    %c0_40 = arith.constant 0 : index
    %c2_41 = arith.constant 2 : index
    %45 = vector.load %arg12[%c0_40, %c2_41] : memref<8x132xf32, #tpu.memory_space<vmem>>, vector<8x128xf32>
    %cst_42 = arith.constant dense<0.000000e+00> : vector<8x128xf32>
    %46 = tpu.matmul %44, %45, %cst_42 {dimension_numbers = #tpu.dot_dimension_numbers<[1], [0], [0], [1], [0, 0, 1, 1], [], []>} : vector<8x8xf32>, vector<8x128xf32>, vector<8x128xf32> -> vector<8x128xf32>
    %47 = arith.addf %42, %46 : vector<8x128xf32>
    %c2_43 = arith.constant 2 : index
    %c0_44 = arith.constant 0 : index
    %c0_45 = arith.constant 0 : index
    %48 = vector.load %arg5[%c2_43, %c0_44, %c0_45] : memref<3x8x8xf32, #tpu.memory_space<vmem>>, vector<1x8x8xf32>
    %49 = vector.shape_cast %48 : vector<1x8x8xf32> to vector<8x8xf32>
    %c0_46 = arith.constant 0 : index
    %c4_47 = arith.constant 4 : index
    %50 = vector.load %arg12[%c0_46, %c4_47] : memref<8x132xf32, #tpu.memory_space<vmem>>, vector<8x128xf32>
    %cst_48 = arith.constant dense<0.000000e+00> : vector<8x128xf32>
    %51 = tpu.matmul %49, %50, %cst_48 {dimension_numbers = #tpu.dot_dimension_numbers<[1], [0], [0], [1], [0, 0, 1, 1], [], []>} : vector<8x8xf32>, vector<8x128xf32>, vector<8x128xf32> -> vector<8x128xf32>
    %52 = arith.addf %47, %51 : vector<8x128xf32>
    %c0_49 = arith.constant 0 : index
    %c0_50 = arith.constant 0 : index
    %53 = vector.load %arg6[%c0_49, %c0_50] : memref<8x1xf32, #tpu.memory_space<vmem>>, vector<8x1xf32>
    %54 = vector.broadcast %53 : vector<8x1xf32> to vector<8x128xf32>
    %55 = arith.addf %52, %54 : vector<8x128xf32>
    %cst_51 = arith.constant 0.000000e+00 : f32
    %56 = vector.broadcast %cst_51 : f32 to vector<8x128xf32>
    %57 = arith.cmpf ogt, %55, %56 : vector<8x128xf32>
    %58 = vector.broadcast %10 : f32 to vector<8x128xf32>
    %59 = arith.mulf %58, %55 : vector<8x128xf32>
    %60 = arith.select %57, %55, %59 : vector<8x128xi1>, vector<8x128xf32>
    %c0_52 = arith.constant 0 : index
    %c0_53 = arith.constant 0 : index
    %61 = vector.load %arg8[%c0_52, %c0_53] : memref<8x4xf32, #tpu.memory_space<vmem>>, vector<8x4xf32>
    %cst_54 = arith.constant dense<0.000000e+00> : vector<8x128xf32>
    %62 = tpu.matmul %61, %7, %cst_54 {dimension_numbers = #tpu.dot_dimension_numbers<[1], [0], [0], [1], [0, 0, 1, 1], [], []>} : vector<8x4xf32>, vector<4x128xf32>, vector<8x128xf32> -> vector<8x128xf32>
    %c0_55 = arith.constant 0 : index
    %c0_56 = arith.constant 0 : index
    %63 = vector.load %arg9[%c0_55, %c0_56] : memref<8x1xf32, #tpu.memory_space<vmem>>, vector<8x1xf32>
    %64 = vector.broadcast %63 : vector<8x1xf32> to vector<8x128xf32>
    %65 = arith.addf %62, %64 : vector<8x128xf32>
    %66 = arith.addf %60, %65 : vector<8x128xf32>
    %cst_57 = arith.constant 0.000000e+00 : f32
    %67 = vector.broadcast %cst_57 : f32 to vector<8x128xf32>
    %68 = arith.cmpf ogt, %66, %67 : vector<8x128xf32>
    %69 = vector.broadcast %11 : f32 to vector<8x128xf32>
    %70 = arith.mulf %69, %66 : vector<8x128xf32>
    %71 = arith.select %68, %66, %70 : vector<8x128xi1>, vector<8x128xf32>
    %c0_58 = arith.constant 0 : index
    %c0_59 = arith.constant 0 : index
    %c0_60 = arith.constant 0 : index
    %72 = vector.load %arg10[%c0_58, %c0_59, %c0_60] : memref<1x8x128xf32, #tpu.memory_space<vmem>>, vector<1x8x128xf32>
    %73 = vector.shape_cast %72 : vector<1x8x128xf32> to vector<8x128xf32>
    %74 = vector.shape_cast %71 : vector<8x128xf32> to vector<1x8x128xf32>
    tpu.vector_store %arg10[%c0_58, %c0_59, %c0_60], %74 {strides = array<i32>} : memref<1x8x128xf32, #tpu.memory_space<vmem>>, vector<1x8x128xf32>,
    return
  }
  func.func @transform_0(%arg0: i32, %arg1: i32) -> (i32, i32, i32) {
    %c0_i32 = arith.constant 0 : i32
    %c0_i32_0 = arith.constant 0 : i32
    return %arg0, %c0_i32, %arg1 : i32, i32, i32
  }
  func.func @transform_1(%arg0: i32, %arg1: i32) -> (i32, i32, i32) {
    %c0_i32 = arith.constant 0 : i32
    %c0_i32_0 = arith.constant 0 : i32
    %c0_i32_1 = arith.constant 0 : i32
    %c0_i32_2 = arith.constant 0 : i32
    return %c0_i32, %c0_i32_0, %c0_i32_1 : i32, i32, i32
  }
  func.func @transform_2(%arg0: i32, %arg1: i32) -> (i32, i32) {
    %c0_i32 = arith.constant 0 : i32
    %c0_i32_0 = arith.constant 0 : i32
    %c0_i32_1 = arith.constant 0 : i32
    return %c0_i32, %c0_i32_0 : i32, i32
  }
  func.func @transform_3(%arg0: i32, %arg1: i32) -> (i32, i32, i32) {
    %c0_i32 = arith.constant 0 : i32
    %c0_i32_0 = arith.constant 0 : i32
    %c0_i32_1 = arith.constant 0 : i32
    %c0_i32_2 = arith.constant 0 : i32
    return %c0_i32, %c0_i32_0, %c0_i32_1 : i32, i32, i32
  }
  func.func @transform_4(%arg0: i32, %arg1: i32) -> (i32, i32) {
    %c0_i32 = arith.constant 0 : i32
    %c0_i32_0 = arith.constant 0 : i32
    %c0_i32_1 = arith.constant 0 : i32
    return %c0_i32, %c0_i32_0 : i32, i32
  }
  func.func @transform_5(%arg0: i32, %arg1: i32) -> i32 {
    %c0_i32 = arith.constant 0 : i32
    %c0_i32_0 = arith.constant 0 : i32
    return %c0_i32 : i32
  }
  func.func @transform_6(%arg0: i32, %arg1: i32) -> (i32, i32) {
    %c0_i32 = arith.constant 0 : i32
    %c0_i32_0 = arith.constant 0 : i32
    %c0_i32_1 = arith.constant 0 : i32
    return %c0_i32, %c0_i32_0 : i32, i32
  }
  func.func @transform_7(%arg0: i32, %arg1: i32) -> (i32, i32) {
    %c0_i32 = arith.constant 0 : i32
    %c0_i32_0 = arith.constant 0 : i32
    %c0_i32_1 = arith.constant 0 : i32
    return %c0_i32, %c0_i32_0 : i32, i32
  }
  func.func @transform_8(%arg0: i32, %arg1: i32) -> (i32, i32, i32) {
    %c0_i32 = arith.constant 0 : i32
    %c0_i32_0 = arith.constant 0 : i32
    return %arg0, %c0_i32, %arg1 : i32, i32, i32
  }
}

</mosaic_0001>

<bundles_post_ra>
// kernel: tpu_custom_call.1
= control target key start
LH: loop header
LB: loop body
LE: loop exit
PB: predicated region body
PF: predicated region fallthrough
CT: control target
= control target key end

     0   :  { %13 = vsyncpa [#allocation6], 0  ;;  %s1597_s0 = inlined_call_operand.vmem [shape: f32[2,4,128], index: 0, kind: input, shape index: {}]   ;;  %s1598_s1 = inlined_call_operand.vmem [shape: f32[3,8,4], index: 1, kind: input, shape index: {}]   ;;  %s1599_s2 = inlined_call_operand.vmem [shape: f32[8,1], index: 2, kind: input, shape index: {}]   ;;  %s1600_s3 = inlined_call_operand.vmem [shape: f32[3,8,8], index: 3, kind: input, shape index: {}]   ;;  %s1601_s4 = inlined_call_operand.vmem [shape: f32[8,1], index: 4, kind: input, shape index: {}]   ;;  %s1602_s5 = inlined_call_operand.vmem [shape: f32[3], index: 5, kind: input, shape index: {}]   ;;  %s1603_s6 = inlined_call_operand.vmem [shape: f32[8,4], index: 6, kind: input, shape index: {}]   ;;  %s1604_s7 = inlined_call_operand.vmem [shape: f32[8,1], index: 7, kind: input, shape index: {}]   ;;  %s1605_s8 = inlined_call_operand.hbm [shape: f32[2,8,128], index: 8, kind: output, shape index: {}]  }
   0x1   :  { %14 = vsyncpa [#allocation5], 0 }
   0x2   :  { %16 = vsyncpa [#allocation5 + $0x1], 0  ;;  %s1386_s27 = smov 0   ;;  %s1388_s28 = smov 0  }
   0x3   :  { %s1390_s29 = smov 0   ;;  %s1392_s30 = smov 0  }
   0x4   :  { %s1394_s9 = smov 0   ;;  %s1396_s10 = smov 0  }
   0x5 LB: > { %s1082_s11 = sadd.s32 4294967295, %s1331_s10   ;;  %s1083_s12 = sadd.s32 4294967294, %s1331_s10   ;;  %s1331_s10 = sphi %s1396_s10, %s22_s10   ;;  %s1327_s9 = sphi %s1394_s9, %s1614_s9   ;;  %s1323_s30 = sphi %s1392_s30, %s1613_s30   ;;  %s1319_s29 = sphi %s1390_s29, %s1612_s29   ;;  %s1315_s28 = sphi %s1388_s28, %s1611_s28   ;;  %s1311_s27 = sphi %s1386_s27, %s1610_s27  }
   0x6   : > { %s34_s13 = sadd.s32 1, %s1327_s9  ;;  %s218_s14 = sadd.s32 1, %s1319_s29 }
   0x7   : > { %p36_p0 = scmp.ge.s32.totalorder %s34_s13, 2  ;;  %p228_p1 = scmp.ne.s32.totalorder %s1319_s29, %s1315_s28 }
   0x8   : > { %p229_p2 = scmp.eq.s32.totalorder %s1082_s11, 1  ;;  %p234_p3 = scmp.ne.s32.totalorder %s1315_s28, %s1311_s27 }
   0x9   : > { %s1616_s13 = smov (%p36_p0, %s34_s13), 0  ;;  %p235_p5 = scmp.eq.s32.totalorder %s1083_s12, 1 }
   0xa   : > { %p1426_p4 = por %p229_p2, %p228_p1  ;;  %s213_s16 = ssub.s32 %s1327_s9, %s1616_s13 }
   0xb   : > { %p1084_p6 = scmp.ge.s32.totalorder %s1331_s10, 1  ;;  %p216_p7 = scmp.eq.s32.totalorder %s213_s16, 0 }
   0xc   : > { %p1433_p8 = por %p235_p5, %p234_p3  ;;  %p242_p9 = scmp.lt.s32.totalorder %s1331_s10, 3 }
   0xd   : > { %s1439_s18 = scalar_select %p216_p7, %s1319_s29, %s218_s14  }
   0xe   : > { %p1441_p10 = pnand %p1084_p6, %p242_p9  ;;  %p1445_p11 = scmp.eq.s32.totalorder %s1082_s11, 0 }
   0xf   : > { %s267_s23 = sshll.u32 %s1602_s5, 4  ;;  %s268_s23 = int_to_ptr.vmem [resolvable:$true] %s267_s23 }
  0x10   : > { %p1167_p12 = pneg %p1441_p10  ;;  %s1236_s24 = scalar_lea.vmem %s268_s23, 16 }
  0x11   : > { %p1237_p0 = scmp.ne.s32.totalorder %s268_s23, %s1236_s24  ;;  %p1244_p5 = scmp.lt.s32.totalorder %s268_s23, %s268_s23 }
  0x12   : > { %p1168_p13 = pnand %p1445_p11, %p1167_p12  ;;  %p1245_p6 = scmp.lt.s32.totalorder %s1236_s24, %s1236_s24 }
  0x14   : > { %p1238_p1 = pneg %p1168_p13  ;;  %p1246_p7 = por %p1245_p6, %p1244_p5 }
  0x16   : > { %p1239_p2 = pnand %p1238_p1, %p1237_p0 }
  0x18   : > { %p1240_p3 = pneg %p1239_p2 }
  0x1a   : > { %p1247_p9 = pnand %p1246_p7, %p1240_p3 }
  0x1c   : > { %1250 = shalt.err (!%p1247_p9)
}
  0x1d   : > { %s1333_s25 = smov [#allocation4]   ;;  %296 = sbr.rel (%p1441_p10) target bundleno = 957 (0x3bd), region = 52 }
  0x1e   : > { %1170 = dma.vmem_to_smem (!%p1168_p13), %s268_s23, 16, %s1333_s25, [#allocation6]  }
  0x22   : > { %1302 = dma.done.wait (%p1445_p11), [#allocation6], 16  }
  0x23   : > { %1304 = vsyncadd (%p1445_p11), [#allocation6], 4294967280 }
  0x24   : > { %302 = sfence }
  0x25   : > { %p333_p12 = scmp.lt.s32.totalorder %s1323_s30, 1  ;;  %vm344_vm0 = vcmask 27648   ;;  %vm346_vm1 = vcmask 31744   ;;  %v1334_v0 = vmov 0.0   ;;  %s1335_s19 = smov 4   ;;  %vm366_vm2 = vcmask 1043488  }
  0x26   : > { %345 = vst.msk [vmem:[#allocation2] sm:$0xf] %vm344_vm0, %v1334_v0  ;;  %1131 = vmatprep.subr.mxu1 %v1334_v0  ;;  %1126 = vmatprep.subr.mxu0 %v1334_v0  ;;  %vm367_vm3 = vcmask 31748   ;;  %vm1336_vm5 = vmmov 0   ;;  %v1337_v5 = vmov 0   ;;  %vm389_vm6 = vcmask 1043456  }
  0x27   : > { %347 = vst.msk [vmem:[#allocation3] sm:$0xff] %vm346_vm1, %v1334_v0  ;;  %s334_s26 = scalar_select %p333_p12, %s1323_s30, 1  ;;  %vm368_vm4 = vmor %vm367_vm3, %vm366_vm2  ;;  %1128 = vmatprep.mubr.msk.f32.mxu0 %vm1336_vm5, %v1334_v0  ;;  %1133 = vmatprep.mubr.msk.f32.mxu1 %vm1336_vm5, %v1334_v0  ;;  %v373_v6 = vld [vmem:[%s1598_s1] sm:$0xff]  ;;  %vm384_vm7 = vcmask 1031168   ;;  %v1093_v13 = vld [vmem:[%s1598_s1 + $0x8] sm:$0xff]  ;;  %vm547_vm8 = vcmask 1014784  }
  0x28   : > { %1233 = vset.pattern.permute.xlu1 %v1337_v5  ;;  %1234 = vset.pattern.permute.xlu0 %v1337_v5  ;;  %s1338_s22 = smov 126   ;;  %s1339_s23 = smov 124   ;;  %v625_v10 = vld [vmem:[%s1599_s2] sm:$0xff]  ;;  %v1098_v17 = vld [vmem:[%s1598_s1 + $0x10] sm:$0xff]  ;;  %vm640_vm10 = vcmask 1047584   ;;  %vm656_vm11 = vcmask 64512  }
  0x29   : > { %s1090_s11 = sshll.u32 %s334_s26, 2  ;;  %v643_v35 = vld [vmem:[%s1600_s3] sm:$0xff]  ;;  %v1101_v41 = vld [vmem:[%s1600_s3 + $0x8] sm:$0xff]  ;;  %v1104_v45 = vld [vmem:[%s1600_s3 + $0x10] sm:$0xff]  ;;  %s1091_s20 = sld [smem:[#allocation4 + $0x1]] }
  0x2a   : > { %s339_s16 = scalar_lea.vmem %s1597_s0, %s1090_s11  ;;  %v896_v36 = vld [vmem:[%s1603_s6] sm:$0xff]  ;;  %s1092_s21 = sld [smem:[#allocation4 + $0x2]] }
  0x2b   : > { %v1472_v1 = vld [vmem:[%s339_s16] sm:$0xf]  ;;  %s370_s16 = sld [smem:[#allocation4]] }
  0x2c   : > { %360 = vrot.lane.b32.xlu0 %v1472_v1, %s1335_s19  ;;  %v885_v37 = vld [vmem:[%s1601_s4] sm:$0xff] }
  0x2d   : > { %v897_v38 = vld [vmem:[%s1604_s7] sm:$0xff] }
  0x2f   : > { %v893_v58 = vstv %s1091_s20  ;;  %s1340_s20 = smov [#allocation7]  }
  0x31   : > { %v633_v28 = vstv %s370_s16 }
  0x9e   : > { %v361_v2 = vpop.permute.xlu0 %360 }
  0x9f   : > { %v362_v3 = vrot.slane %v361_v2, 4 }
  0xa1   : > { %v364_v4 = vsel %vm346_vm1, %v362_v3, %v361_v2 }
  0xa2   : > { %369 = vst.msk [vmem:[#allocation2] sm:$0xff] %vm368_vm4, %v364_v4 }
  0xa9   : > { %v377_v7 = vld [vmem:[#allocation2] sm:$0xff] }
  0xaa   : > { %v374_v8 = vld [vmem:[#allocation2] sm:$0xf]  ;;  %380 = vrot.lane.b32.xlu0 %v377_v7, %s1338_s22  ;;  %v379_v9 = vcombine.high %v377_v7, %v377_v7 }
  0xab   : > { %1132 = vmatpush3.msk.msra.mxu1 %vm389_vm6, %v374_v8 }
  0xac   : > { %1134 = vmatmul.mubr.msk.f32.vlgmr.msra.gmra.mxu1 %vm346_vm1, %v373_v6  ;;  %1141 = vmatprep.subr.mxu1 %v1334_v0 }
  0xad   : > { %382 = vrot.lane.b32.xlu1 %v379_v9, %s1338_s22  ;;  %1143 = vmatprep.mubr.msk.f32.mxu1 %vm1336_vm5, %v1334_v0 }
  0xae   : > { %545 = vrot.lane.b32.xlu0 %v379_v9, %s1339_s23 }
  0xb1   : > { %543 = vrot.lane.b32.xlu1 %v377_v7, %s1339_s23 }
  0xb5   : > { %628 = vperm.xlu1 %1233, %v625_v10  }
 0x11c   : > { %v381_v11 = vpop.permute.xlu0 %380 }
 0x11f   : > { %v383_v12 = vpop.permute.xlu1 %382 }
 0x120   : > { %v385_v14 = vsel %vm384_vm7, %v381_v11, %v383_v12  ;;  %v546_v15 = vpop.permute.xlu0 %545 }
 0x121   : > { %1127 = vmatpush3.msk.msra.mxu0 %vm389_vm6, %v385_v14 }
 0x122   : > { %1129 = vmatmul.mubr.msk.f32.vlgmr.msra.gmra.mxu0 %vm346_vm1, %v1093_v13  ;;  %1136 = vmatprep.subr.mxu0 %v1334_v0 }
 0x123   : > { %v544_v16 = vpop.permute.xlu1 %543  ;;  %1138 = vmatprep.mubr.msk.f32.mxu0 %vm1336_vm5, %v1334_v0 }
 0x124   : > { %v548_v18 = vsel %vm547_vm8, %v544_v16, %v546_v15 }
 0x125   : > { %1137 = vmatpush3.msk.msra.mxu0 %vm389_vm6, %v548_v18 }
 0x126   : > { %1139 = vmatmul.mubr.msk.f32.vlgmr.msra.gmra.mxu0 %vm346_vm1, %v1098_v17  ;;  %1146 = vmatprep.subr.mxu0 %v1334_v0 }
 0x127   : > { %1148 = vmatprep.mubr.msk.f32.mxu0 %vm1336_vm5, %v1334_v0 }
 0x130   : > { %v629_v25 = vpop.permute.xlu1 %628 }
 0x16c   : > { %v534_v19 = vpop.f32.mrf.mxu1 }
 0x16e   : > { %v1135_v20 = vpop.f32.mrf.mxu1 }
 0x1e2   : > { %v458_v21 = vpop.f32.mrf.mxu0 }
 0x1e3   : > { %v535_v23 = vadd.f32 %v534_v19, %v458_v21 }
 0x1e4   : > { %v1130_v22 = vpop.f32.mrf.mxu0 }
 0x1e6   : > { %v620_v24 = vpop.f32.mrf.mxu0 }
 0x1e7   : > { %v624_v26 = vadd.f32 %v620_v24, %v535_v23 }
 0x1e8   : > { %v1140_v27 = vpop.f32.mrf.mxu0 }
 0x1e9   : > { %v631_v29 = vadd.f32 %v629_v25, %v624_v26 }
 0x1eb   : > { %v634_v30 = vmul.f32 %v633_v28, %v631_v29  ;;  %vm632_vm9 = vcmp.gt.f32.partialorder %v631_v29, 0.0 }
 0x1ed   : > { %v635_v31 = vsel %vm632_vm9, %v631_v29, %v634_v30 }
 0x1ee   : > { %637 = vrot.lane.b32.xlu0 %v635_v31, %s1335_s19  ;;  %s330_s19 = sand.u32 1, %s1315_s28  }
 0x1ef   : > { %s1089_s24 = sshll.u32 %s330_s19, 3 }
 0x1f0   : > { %s332_s25 = scalar_lea.vmem [#allocation7], %s1089_s24 }
 0x1f1   : > { %s999_s26 = sshll.u32 %s332_s25, 4  ;;  %s1000_s26 = int_to_ptr.vmem [resolvable:$true] %s999_s26 }
 0x1f2   : > { %s1251_s16 = scalar_lea.vmem %s1000_s26, 128 }
 0x1f3   : > { %p1252_p10 = scmp.ne.s32.totalorder %s1000_s26, %s1251_s16 }
 0x1f5   : > { %p1253_p11 = pnand %p1252_p10, %p1426_p4 }
 0x1f7   : > { %p1254_p13 = pneg %p1253_p11 }
 0x260   : > { %v638_v32 = vpop.permute.xlu0 %637 }
 0x261   : > { %641 = vst.msk [vmem:[#allocation3] sm:$0xff] %vm640_vm10, %v638_v32 }
 0x262   : > { %642 = vst.msk [vmem:[#allocation3 + $0x8] sm:$0xff] %vm346_vm1, %v638_v32 }
 0x268   : > { %v644_v34 = vld [vmem:[#allocation3] sm:$0xff] }
 0x269   : > { %v647_v33 = vld [vmem:[#allocation3 + $0x8] sm:$0xff]  ;;  %650 = vrot.lane.b32.xlu1 %v644_v34, %s1338_s22  ;;  %1147 = vmatpush3.msra.mxu0 %v644_v34 }
 0x26a   : > { %652 = vrot.lane.b32.xlu0 %v647_v33, %s1338_s22  ;;  %1149 = vmatmul.mubr.msk.f32.vlgmr.msra.gmra.mxu0 %vm656_vm11, %v643_v35  ;;  %s1109_s22 = sshll.u32 %s1323_s30, 7  ;;  %s1255_s30 = sshll.u32 %s1340_s20, 4  ;;  %s1256_s30 = int_to_ptr.vmem [resolvable:$false] %s1255_s30 }
 0x26b   : > { %1156 = vmatprep.subr.mxu0 %v1334_v0  ;;  %1158 = vmatprep.mubr.msk.f32.mxu0 %vm1336_vm5, %v1334_v0  ;;  %s1557_s14 = scalar_lea.hbm %s1605_s8, %s1109_s22  ;;  %p1258_p0 = scmp.lt.s32.totalorder %s1000_s26, %s1256_s30 }
 0x26c   : > { %1157 = vmatpush3.msk.msra.mxu0 %vm389_vm6, %v1472_v1 }
 0x26d   : > { %805 = vrot.lane.b32.xlu1 %v644_v34, %s1339_s23 }
 0x26e   : > { %807 = vrot.lane.b32.xlu0 %v647_v33, %s1339_s23  ;;  %1159 = vmatmul.mubr.msk.f32.vlgmr.msra.gmra.mxu0 %vm346_vm1, %v896_v36  ;;  %s985_s23 = scalar_lea.sflag [#allocation5], %s330_s19 }
 0x271   : > { %888 = vperm.xlu1 %1233, %v885_v37  }
 0x272   : > { %900 = vperm.xlu0 %1234, %v897_v38  }
 0x2db   : > { %v651_v40 = vpop.permute.xlu1 %650 }
 0x2dc   : > { %v653_v39 = vpop.permute.xlu0 %652 }
 0x2dd   : > { %v654_v42 = vsel %vm384_vm7, %v651_v40, %v653_v39 }
 0x2de   : > { %1142 = vmatpush3.msra.mxu1 %v654_v42 }
 0x2df   : > { %1144 = vmatmul.mubr.msk.f32.vlgmr.msra.gmra.mxu1 %vm656_vm11, %v1101_v41  ;;  %1151 = vmatprep.subr.mxu1 %v1334_v0  ;;  %v806_v44 = vpop.permute.xlu1 %805 }
 0x2e0   : > { %v808_v43 = vpop.permute.xlu0 %807  ;;  %1153 = vmatprep.mubr.msk.f32.mxu1 %vm1336_vm5, %v1334_v0  ;;  %v980_v0 = vstv %s1092_s21  ;;  %s1257_s21 = scalar_lea.vmem %s1256_s30, 256 }
 0x2e1   : > { %v809_v46 = vsel %vm547_vm8, %v806_v44, %v808_v43  ;;  %p1259_p1 = scmp.lt.s32.totalorder %s1257_s21, %s1251_s16 }
 0x2e2   : > { %1152 = vmatpush3.msra.mxu1 %v809_v46 }
 0x2e3   : > { %1154 = vmatmul.mubr.msk.f32.vlgmr.msra.gmra.mxu1 %vm656_vm11, %v1104_v45  ;;  %p1260_p2 = por %p1259_p1, %p1258_p0 }
 0x2e5   : > { %p1261_p3 = pnand %p1260_p2, %p1254_p13 }
 0x2ec   : > { %v889_v57 = vpop.permute.xlu1 %888 }
 0x2ed   : > { %v901_v56 = vpop.permute.xlu0 %900 }
 0x32a   : > { %v799_v47 = vpop.f32.mrf.mxu0 }
 0x32c   : > { %v1150_v48 = vpop.f32.mrf.mxu0 }
 0x32e   : > { %v974_v49 = vpop.f32.mrf.mxu0 }
 0x32f   : > { %v975_v61 = vadd.f32 %v974_v49, %v901_v56 }
 0x330   : > { %v1160_v50 = vpop.f32.mrf.mxu0 }
 0x39f   : > { %v726_v51 = vpop.f32.mrf.mxu1 }
 0x3a0   : > { %v800_v53 = vadd.f32 %v799_v47, %v726_v51 }
 0x3a1   : > { %v1145_v52 = vpop.f32.mrf.mxu1 }
 0x3a3   : > { %v880_v54 = vpop.f32.mrf.mxu1 }
 0x3a4   : > { %v884_v55 = vadd.f32 %v880_v54, %v800_v53 }
 0x3a5   : > { %v1155_v59 = vpop.f32.mrf.mxu1 }
 0x3a6   : > { %v891_v60 = vadd.f32 %v889_v57, %v884_v55 }
 0x3a8   : > { %v894_v62 = vmul.f32 %v893_v58, %v891_v60  ;;  %vm892_vm12 = vcmp.gt.f32.partialorder %v891_v60, 0.0 }
 0x3aa   : > { %v895_v63 = vsel %vm892_vm12, %v891_v60, %v894_v62 }
 0x3ab   : > { %v978_v1 = vadd.f32 %v975_v61, %v895_v63 }
 0x3ad   : > { %v981_v2 = vmul.f32 %v980_v0, %v978_v1  ;;  %vm979_vm13 = vcmp.gt.f32.partialorder %v978_v1, 0.0 }
 0x3af   : > { %v982_v3 = vsel %vm979_vm13, %v978_v1, %v981_v2 }
 0x3b0   : > { %983 = vst [vmem:[%s332_s25] sm:$0xff] %v982_v3 }
 0x3b1   : > { %1264 = shalt.err (!%p1261_p3)
}
 0x3b2   : > { %s1265_s24 = scalar_lea.hbm %s1557_s14, 128  ;;  %s1269_s25 = scalar_lea.hbm %s1605_s8, 256 }
 0x3b3   : > { %p1266_p5 = scmp.ne.s32.totalorder %s1557_s14, %s1265_s24  ;;  %p1270_p9 = scmp.lt.s32.totalorder %s1557_s14, %s1605_s8 }
 0x3b4   : > { %p1271_p12 = scmp.lt.s32.totalorder %s1269_s25, %s1265_s24 }
 0x3b5   : > { %p1267_p6 = pnand %p1266_p5, %p1426_p4 }
 0x3b6   : > { %p1272_p10 = por %p1271_p12, %p1270_p9 }
 0x3b7   : > { %p1268_p7 = pneg %p1267_p6 }
 0x3b9   : > { %p1273_p11 = pnand %p1272_p10, %p1268_p7 }
 0x3bb   : > { %1276 = shalt.err (!%p1273_p11)
}
 0x3bc   : > { %1165 = dma.vmem_to_hbm [thread:$0]  (%p1426_p4), %s1000_s26, 128, %s1557_s14, %s985_s23  }
 0x3bd PF: > { %p1177_p13 = scmp.ge.s32.totalorder %s1331_s10, 2  ;;  %s1011_s16 = sand.u32 1, %s1311_s27  }
 0x3be   : > { %s1012_s20 = scalar_lea.sflag [#allocation5], %s1011_s16 }
 0x3bf   : > { %p1172_p0 = pnand %p1177_p13, %p1433_p8 }
 0x3c1   : > { %p1173_p1 = pneg %p1172_p0 }
 0x3c3   : > { %1306 = dma.done.wait (%p1173_p1), %s1012_s20, 128  }
 0x3c4   : > { %1308 = vsyncadd (%p1173_p1), %s1012_s20, 4294967168  ;;  %s22_s10 = sadd.s32 1, %s1331_s10   ;;  %s1610_s27 = smov %s1315_s28 }
 0x3c5   : > { %p19_p2 = scmp.ge.s32.totalorder %s22_s10, 4   ;;  %s1611_s28 = smov %s1319_s29 }
 0x3c6   : > { %s1612_s29 = smov %s1439_s18  ;;  %s1613_s30 = smov %s1327_s9 }
 0x3c7   : > { %s1614_s9 = smov %s1616_s13  ;;  %21 = sbr.rel (!%p19_p2) target bundleno = 5 (0x5), region = 104 }
 0x3cc   :  { %1017 = vsyncpa [#allocation5], 1 }
 0x3cd   :  { %1019 = vsyncpa [#allocation5 + $0x1], 1 }
 0x3ce   :  { %1020 = vsyncpa [#allocation6], 1 }
 0x3cf   :  { %1022 = vsyncpa [#allocation6 + $0x1], 1 }

</bundles_post_ra>
